<compile_context>
chip_gen: v5e
topology: v5e:2x2
jax: 0.10.0
libtpu: 0.0.40
codegen_flags: <defaults>
</compile_context>

<pallas_src>
import jax
import jax.numpy as jnp
import numpy as np
from jax.experimental import pallas as pl
from jax.experimental.pallas import tpu as pltpu


# ----------------------------------------------------------------------------
# Pallas kernel: per-model LM head -> masked softmax over the union vocab
#                -> weighted sum (single invocation, model loop unrolled)
# ----------------------------------------------------------------------------
def ensemble_kernel(w_ref, h_ref, head_ref, mask_ref, out_ref):
    num_models = h_ref.shape[0]
    acc = None
    for m in range(num_models):                       # static unroll (M is tiny)
        # logits over the union vocabulary; union_map is already folded into
        # head_u, so there is no second (scatter) matmul.
        logits = jnp.dot(h_ref[m], head_ref[m],
                         preferred_element_type=jnp.float32)     # (B, Vu_pad) f32
        logits = logits + mask_ref[m]                 # -1e9 on non-member / pad columns

        # numerically stable softmax in f32; divide on the EUP (approx
        # reciprocal), ensemble weight folded into the same scale.
        row_max = jnp.max(logits, axis=-1, keepdims=True)
        ex = jnp.exp(logits - row_max)
        denom = jnp.sum(ex, axis=-1, keepdims=True)
        scale = w_ref[m] * pl.reciprocal(denom, approx=True)     # (B, 1)
        contrib = ex * scale                                      # (B, Vu_pad)

        acc = contrib if acc is None else acc + contrib
    out_ref[...] = acc                                # write once, no zero-init pass


def ensemble_forward(weights, hidden, head_u, mask_u):
    M, B, H = hidden.shape
    Vu_pad = head_u.shape[2]
    # Demo-scale problem (M=2, B=2, Vu_pad=256): everything fits VMEM trivially,
    # so a single grid step (no pipeline machinery) is fastest.
    # TODO(synk): for realistic vocab sizes, tile the union vocab with a
    # two-pass / online-softmax normalization, size the tile for per-generation
    # VMEM (64 MiB/TC on v7x vs 128 MiB on v5e/v6e), and expose a "parallel"
    # grid axis over the Vu tiles / batch for the v7x dual TensorCores.
    return pl.pallas_call(
        ensemble_kernel,
        out_shape=jax.ShapeDtypeStruct((B, Vu_pad), jnp.float32),
        in_specs=[
            pl.BlockSpec(memory_space=pltpu.MemorySpace.SMEM),   # weights (scalar reads)
            pl.BlockSpec(memory_space=pltpu.MemorySpace.VMEM),   # hidden
            pl.BlockSpec(memory_space=pltpu.MemorySpace.VMEM),   # folded LM heads
            pl.BlockSpec(memory_space=pltpu.MemorySpace.VMEM),   # union vocab masks
        ],
        out_specs=pl.BlockSpec(memory_space=pltpu.MemorySpace.VMEM),
    )(weights, hidden, head_u, mask_u)


# ----------------------------------------------------------------------------
# Glue: synthetic "causal LM" backbone (stand-in for AutoModelForCausalLM)
# ----------------------------------------------------------------------------
def synthetic_backbone_hidden(input_ids, emb, w1, b1):
    x = emb[input_ids]                 # (B, S, H) embedding lookup
    pooled = jnp.mean(x, axis=1)       # (B, H)   crude context summary
    return jnp.tanh(pooled @ w1 + b1)  # (B, H)   last-position hidden state


def reference_forward(weights_np, hidden_f32, heads_f32, union_ids, Vu):
    """Original (unfolded) module semantics: per-model softmax over its own
    vocab, then weighted scatter into the union vocabulary."""
    M = len(heads_f32)
    B = hidden_f32.shape[1]
    out = np.zeros((B, Vu), np.float32)
    for m in range(M):
        logits = hidden_f32[m] @ heads_f32[m]                    # (B, V_m)
        logits = logits - logits.max(axis=-1, keepdims=True)
        p = np.exp(logits)
        p = p / p.sum(axis=-1, keepdims=True)
        out[:, union_ids[m]] += weights_np[m] * p
    return out


if __name__ == "__main__":
    # -------- problem sizes (small, consistent with the module's forward) ----
    B, S, H = 2, 8, 32                       # batch, sequence, hidden
    M = 2                                    # number of ensembled models
    vocab_sizes = [96, 112]                  # per-model vocab sizes

    # -------- synthetic tokenizers / union vocab (deterministic) -------------
    model_vocab_tokens = [
        [f"tok{i}" for i in range(96)],           # model 0: tok0 .. tok95
        [f"tok{i}" for i in range(48, 160)],      # model 1: tok48 .. tok159
    ]
    union_tokens = sorted(set().union(*(set(v) for v in model_vocab_tokens)),
                          key=lambda t: int(t[3:]))
    union_vocab = {t: i for i, t in enumerate(union_tokens)}
    Vu = len(union_vocab)                                 # 160
    Vu_pad = ((Vu + 255) // 256) * 256                    # 256 (lane/MXU aligned)

    # per-model:  model vocab id -> union vocab id
    union_ids = [np.array([union_vocab[t] for t in toks], np.int32)
                 for toks in model_vocab_tokens]

    # default uniform ensemble weights, as in the module
    weights_np = np.full((M,), 1.0 / M, np.float32)

    # -------- deterministic synthetic parameters ------------------------------
    key = jax.random.PRNGKey(0)
    keys = jax.random.split(key, 1 + 4 * M)
    input_ids = jax.random.randint(keys[0], (B, S), 0, min(vocab_sizes),
                                   dtype=jnp.int32)

    heads_bf16 = []
    hidden_rows = []
    for m in range(M):
        k_e, k_w, k_b, k_h = keys[1 + 4 * m: 1 + 4 * (m + 1)]
        emb = jax.random.normal(k_e, (vocab_sizes[m], H), jnp.float32) * 0.1
        w1 = jax.random.normal(k_w, (H, H), jnp.float32) * 0.1
        b1 = jax.random.normal(k_b, (H,), jnp.float32) * 0.1
        head_m = jax.random.normal(k_h, (H, vocab_sizes[m]), jnp.float32) * 0.1
        hidden_rows.append(synthetic_backbone_hidden(input_ids, emb, w1, b1))
        heads_bf16.append(head_m.astype(jnp.bfloat16))    # bf16 matmul operand

    hidden_bf16 = jnp.stack(hidden_rows, axis=0).astype(jnp.bfloat16)  # (M, B, H)

    # -------- fold union_map into the LM head offline -------------------------
    # head_u[m][:, union_id] = head_w[m][:, model_id];  mask_u marks member columns.
    head_u_np = np.zeros((M, H, Vu_pad), np.float32)
    mask_u_np = np.full((M, 1, Vu_pad), -1e9, np.float32)
    heads_f32_np = []
    for m in range(M):
        head_f32 = np.asarray(heads_bf16[m].astype(jnp.float32))      # (H, V_m)
        heads_f32_np.append(head_f32)
        head_u_np[m][:, union_ids[m]] = head_f32
        mask_u_np[m, 0, union_ids[m]] = 0.0

    head_u = jnp.asarray(head_u_np).astype(jnp.bfloat16)   # (M, H, Vu_pad) bf16
    mask_u = jnp.asarray(mask_u_np)                        # (M, 1, Vu_pad) f32
    weights = jnp.asarray(weights_np)                      # (M,) f32 -> SMEM

    # -------- run Pallas kernel ------------------------------------------------
    out_pad = ensemble_forward(weights, hidden_bf16, head_u, mask_u)
    out_pad = jax.block_until_ready(out_pad)
    union_probs = out_pad[:, :Vu]                          # (B, Vu), as in the module

    # -------- verify against the original (unfolded) semantics ----------------
    hidden_f32_np = np.asarray(hidden_bf16.astype(jnp.float32))
    ref = reference_forward(weights_np, hidden_f32_np, heads_f32_np, union_ids, Vu)

    # tolerance loosened vs f32-exact because of pl.reciprocal(approx=True)
    np.testing.assert_allclose(np.asarray(union_probs), ref, rtol=5e-3, atol=1e-4)
    # padded union columns are fully masked -> exactly zero probability
    np.testing.assert_allclose(np.asarray(out_pad[:, Vu:]), 0.0, atol=1e-6)
    assert union_probs.shape == (B, Vu)

    print("KERNEL_OK")
</pallas_src>

<mosaic_0001>
module attributes {stable_mosaic.version = 11 : i64} {
  func.func @ensemble_kernel(%arg0: memref<2xf32, #tpu.memory_space<smem>>, %arg1: memref<2x2x32xbf16, #tpu.memory_space<vmem>>, %arg2: memref<2x32x256xbf16, #tpu.memory_space<vmem>>, %arg3: memref<2x1x256xf32, #tpu.memory_space<vmem>>, %arg4: memref<2x256xf32, #tpu.memory_space<vmem>>) attributes {dimension_semantics = [], scalar_prefetch = 0 : i64, scratch_operands = 0 : i64, tpu.core_type = #tpu.core_type<tc>} {
    %c0 = arith.constant 0 : index
    %c0_0 = arith.constant 0 : index
    %c0_1 = arith.constant 0 : index
    %0 = vector.load %arg1[%c0, %c0_0, %c0_1] : memref<2x2x32xbf16, #tpu.memory_space<vmem>>, vector<1x2x32xbf16>
    %1 = vector.shape_cast %0 : vector<1x2x32xbf16> to vector<2x32xbf16>
    %c0_2 = arith.constant 0 : index
    %c0_3 = arith.constant 0 : index
    %c0_4 = arith.constant 0 : index
    %2 = vector.load %arg2[%c0_2, %c0_3, %c0_4] : memref<2x32x256xbf16, #tpu.memory_space<vmem>>, vector<1x32x256xbf16>
    %3 = vector.shape_cast %2 : vector<1x32x256xbf16> to vector<32x256xbf16>
    %cst = arith.constant dense<0.000000e+00> : vector<2x256xf32>
    %4 = tpu.matmul %1, %3, %cst {dimension_numbers = #tpu.dot_dimension_numbers<[1], [0], [0], [1], [0, 0, 1, 1], [], []>} : vector<2x32xbf16>, vector<32x256xbf16>, vector<2x256xf32> -> vector<2x256xf32>
    %c0_5 = arith.constant 0 : index
    %c0_6 = arith.constant 0 : index
    %c0_7 = arith.constant 0 : index
    %5 = vector.load %arg3[%c0_5, %c0_6, %c0_7] : memref<2x1x256xf32, #tpu.memory_space<vmem>>, vector<1x1x256xf32>
    %6 = vector.shape_cast %5 : vector<1x1x256xf32> to vector<1x256xf32>
    %7 = vector.broadcast %6 : vector<1x256xf32> to vector<2x256xf32>
    %8 = arith.addf %4, %7 : vector<2x256xf32>
    %cst_8 = arith.constant dense<0xFF800000> : vector<2xf32>
    %9 = vector.multi_reduction <maximumf>, %8, %cst_8 [1] : vector<2x256xf32> to vector<2xf32>
    %10 = vector.shape_cast %9 : vector<2xf32> to vector<2x1xf32>
    %11 = vector.broadcast %10 : vector<2x1xf32> to vector<2x256xf32>
    %12 = arith.subf %8, %11 : vector<2x256xf32>
    %13 = math.exp %12 : vector<2x256xf32>
    %cst_9 = arith.constant dense<0.000000e+00> : vector<2xf32>
    %14 = vector.multi_reduction <add>, %13, %cst_9 [1] : vector<2x256xf32> to vector<2xf32>
    %15 = vector.shape_cast %14 : vector<2xf32> to vector<2x1xf32>
    %c0_10 = arith.constant 0 : index
    %16 = memref.load %arg0[%c0_10] : memref<2xf32, #tpu.memory_space<smem>>
    %17 = tpu.reciprocal %15 {approx = true} : vector<2x1xf32> -> vector<2x1xf32>
    %18 = vector.broadcast %16 : f32 to vector<2x1xf32>
    %19 = arith.mulf %18, %17 : vector<2x1xf32>
    %20 = vector.broadcast %19 : vector<2x1xf32> to vector<2x256xf32>
    %21 = arith.mulf %13, %20 : vector<2x256xf32>
    %c1 = arith.constant 1 : index
    %c0_11 = arith.constant 0 : index
    %c0_12 = arith.constant 0 : index
    %22 = vector.load %arg1[%c1, %c0_11, %c0_12] : memref<2x2x32xbf16, #tpu.memory_space<vmem>>, vector<1x2x32xbf16>
    %23 = vector.shape_cast %22 : vector<1x2x32xbf16> to vector<2x32xbf16>
    %c1_13 = arith.constant 1 : index
    %c0_14 = arith.constant 0 : index
    %c0_15 = arith.constant 0 : index
    %24 = vector.load %arg2[%c1_13, %c0_14, %c0_15] : memref<2x32x256xbf16, #tpu.memory_space<vmem>>, vector<1x32x256xbf16>
    %25 = vector.shape_cast %24 : vector<1x32x256xbf16> to vector<32x256xbf16>
    %cst_16 = arith.constant dense<0.000000e+00> : vector<2x256xf32>
    %26 = tpu.matmul %23, %25, %cst_16 {dimension_numbers = #tpu.dot_dimension_numbers<[1], [0], [0], [1], [0, 0, 1, 1], [], []>} : vector<2x32xbf16>, vector<32x256xbf16>, vector<2x256xf32> -> vector<2x256xf32>
    %c1_17 = arith.constant 1 : index
    %c0_18 = arith.constant 0 : index
    %c0_19 = arith.constant 0 : index
    %27 = vector.load %arg3[%c1_17, %c0_18, %c0_19] : memref<2x1x256xf32, #tpu.memory_space<vmem>>, vector<1x1x256xf32>
    %28 = vector.shape_cast %27 : vector<1x1x256xf32> to vector<1x256xf32>
    %29 = vector.broadcast %28 : vector<1x256xf32> to vector<2x256xf32>
    %30 = arith.addf %26, %29 : vector<2x256xf32>
    %cst_20 = arith.constant dense<0xFF800000> : vector<2xf32>
    %31 = vector.multi_reduction <maximumf>, %30, %cst_20 [1] : vector<2x256xf32> to vector<2xf32>
    %32 = vector.shape_cast %31 : vector<2xf32> to vector<2x1xf32>
    %33 = vector.broadcast %32 : vector<2x1xf32> to vector<2x256xf32>
    %34 = arith.subf %30, %33 : vector<2x256xf32>
    %35 = math.exp %34 : vector<2x256xf32>
    %cst_21 = arith.constant dense<0.000000e+00> : vector<2xf32>
    %36 = vector.multi_reduction <add>, %35, %cst_21 [1] : vector<2x256xf32> to vector<2xf32>
    %37 = vector.shape_cast %36 : vector<2xf32> to vector<2x1xf32>
    %c1_22 = arith.constant 1 : index
    %38 = memref.load %arg0[%c1_22] : memref<2xf32, #tpu.memory_space<smem>>
    %39 = tpu.reciprocal %37 {approx = true} : vector<2x1xf32> -> vector<2x1xf32>
    %40 = vector.broadcast %38 : f32 to vector<2x1xf32>
    %41 = arith.mulf %40, %39 : vector<2x1xf32>
    %42 = vector.broadcast %41 : vector<2x1xf32> to vector<2x256xf32>
    %43 = arith.mulf %35, %42 : vector<2x256xf32>
    %44 = arith.addf %21, %43 : vector<2x256xf32>
    %c0_23 = arith.constant 0 : index
    %c0_24 = arith.constant 0 : index
    %45 = vector.load %arg4[%c0_23, %c0_24] : memref<2x256xf32, #tpu.memory_space<vmem>>, vector<2x256xf32>
    tpu.vector_store %arg4[%c0_23, %c0_24], %44 {strides = array<i32>} : memref<2x256xf32, #tpu.memory_space<vmem>>, vector<2x256xf32>,
    return
  }
}

</mosaic_0001>

<bundles_post_ra>
// kernel: tpu_custom_call.1
= control target key start
LH: loop header
LB: loop body
LE: loop exit
PB: predicated region body
PF: predicated region fallthrough
CT: control target
= control target key end

     0   :  { %9 = vsyncpa [#allocation5], 0  ;;  %s519_s0 = inlined_call_operand.hbm [shape: f32[2], index: 0, kind: input, shape index: {}]   ;;  %s520_s1 = inlined_call_operand.hbm [shape: bf16[2,2,32], index: 1, kind: input, shape index: {}]   ;;  %s521_s2 = inlined_call_operand.hbm [shape: bf16[2,32,256], index: 2, kind: input, shape index: {}]   ;;  %s522_s3 = inlined_call_operand.hbm [shape: f32[2,1,256], index: 3, kind: input, shape index: {}]   ;;  %s523_s4 = inlined_call_operand.hbm [shape: f32[2,256], index: 4, kind: output, shape index: {}]  }
   0x1   :  { %10 = vsyncpa [#allocation3], 0 }
   0x2   :  { %11 = vsyncpa [#allocation8], 0  ;;  %s39_s17 = sshll.u32 %s521_s2, 4  ;;  %s40_s17 = int_to_ptr.hbm [resolvable:$true] %s39_s17 }
   0x3   :  { %12 = vsyncpa [#allocation4], 0  ;;  %s459_s18 = smov [#allocation7]   ;;  %s18_s22 = sshll.u32 %s519_s0, 4  ;;  %s19_s22 = int_to_ptr.hbm [resolvable:$true] %s18_s22 }
   0x4   :  { %s41_s19 = sshll.u32 %s459_s18, 4  ;;  %s460_s23 = smov 128   ;;  %s42_s19 = int_to_ptr.vmem [resolvable:$true] %s41_s19 }
   0x5   :  { %s461_s24 = smov 8   ;;  %s462_s25 = smov [#allocation2]  }
   0x6   :  { %47 = dma.hbm_to_vmem [thread:$0]  %s40_s17, 1024, %s42_s19, [#allocation8], %s460_s23, %s460_s23, %s461_s24  }
   0x7   :  { %21 = dma.hbm_to_smem %s19_s22, 16, %s462_s25, [#allocation5]  }
   0x8   :  { %s26_s28 = sshll.u32 %s520_s1, 4  ;;  %s463_s2 = smov [#allocation6]   ;;  %s27_s28 = int_to_ptr.hbm [resolvable:$true] %s26_s28 }
   0x9   :  { %s28_s29 = sshll.u32 %s463_s2, 4  ;;  %s52_s6 = sshll.u32 %s522_s3, 4  ;;  %s29_s29 = int_to_ptr.vmem [resolvable:$true] %s28_s29  ;;  %s53_s6 = int_to_ptr.hbm [resolvable:$true] %s52_s6 }
   0xa   :  { %s464_s7 = smov 16   ;;  %s465_s0 = smov 1  }
   0xb   :  { %34 = dma.hbm_to_vmem [thread:$0]  %s27_s28, 32, %s29_s29, [#allocation3], %s464_s7, %s464_s7, %s465_s0  }
   0xc   :  { %s466_s8 = smov [#allocation9]   ;;  %s467_s10 = smov 32  }
   0xd   :  { %s54_s9 = sshll.u32 %s466_s8, 4  ;;  %s468_s11 = smov 2   ;;  %s55_s9 = int_to_ptr.vmem [resolvable:$true] %s54_s9 }
   0xe   :  { %60 = dma.hbm_to_vmem [thread:$0]  %s53_s6, 64, %s55_s9, [#allocation8], %s467_s10, %s467_s10, %s468_s11  }
   0xf   :  { %451 = dma.done.wait [#allocation5], 16  }
  0x10   :  { %452 = vsyncadd [#allocation5], 4294967280 }
  0x11   :  { %453 = dma.done.wait [#allocation3], 32  }
  0x12   :  { %454 = vsyncadd [#allocation3], 4294967264 }
  0x13   :  { %455 = dma.done.wait [#allocation8], 1088  }
  0x14   :  { %456 = vsyncadd [#allocation8], 4294966208 }
  0x15   :  { %77 = sfence }
  0x16   :  { %v285_v0 = vld [vmem:[#allocation7 + $0x10] sm:$0xf]  ;;  %v315_v1 = vld [vmem:[#allocation7 + $0x14] sm:$0xf0]  ;;  %v314_v2 = vld [vmem:[#allocation7 + $0x14] sm:$0xf] }
  0x17   :  { %v286_v3 = vor.u32 %v315_v1, %v285_v0  ;;  %v287_v4 = vld [vmem:[#allocation7 + $0x18] sm:$0xf0]  ;;  %v303_v5 = vld [vmem:[#allocation7 + $0x30] sm:$0xf]  ;;  %v319_v6 = vld [vmem:[#allocation7 + $0x34] sm:$0xf0] }
  0x18   :  { %v290_v7 = vor.u32 %v314_v2, %v287_v4  ;;  %v304_v8 = vor.u32 %v319_v6, %v303_v5  ;;  %v318_v9 = vld [vmem:[#allocation7 + $0x34] sm:$0xf]  ;;  %v305_v10 = vld [vmem:[#allocation7 + $0x38] sm:$0xf0]  ;;  %v277_v11 = vld [vmem:[#allocation7] sm:$0xf] }
  0x19   :  { %120 = vmatpush.bf16.msra.mxu0 %v286_v3  ;;  %v308_v12 = vor.u32 %v318_v9, %v305_v10  ;;  %v313_v13 = vld [vmem:[#allocation7 + $0x4] sm:$0xf0]  ;;  %v312_v14 = vld [vmem:[#allocation7 + $0x4] sm:$0xf]  ;;  %v279_v15 = vld [vmem:[#allocation7 + $0x8] sm:$0xf0] }
  0x1a   :  { %133 = vmatpush.bf16.msra.mxu1 %v290_v7  ;;  %206 = vmatpush.bf16.msra.mxu2 %v304_v8  ;;  %v278_v16 = vor.u32 %v313_v13, %v277_v11  ;;  %v282_v17 = vor.u32 %v312_v14, %v279_v15  ;;  %v295_v18 = vld [vmem:[#allocation7 + $0x20] sm:$0xf]  ;;  %v317_v19 = vld [vmem:[#allocation7 + $0x24] sm:$0xf0]  ;;  %v316_v20 = vld [vmem:[#allocation7 + $0x24] sm:$0xf] }
  0x1b   :  { %219 = vmatpush.bf16.msra.mxu3 %v308_v12  ;;  %v296_v21 = vor.u32 %v317_v19, %v295_v18  ;;  %v297_v22 = vld [vmem:[#allocation7 + $0x28] sm:$0xf0]  ;;  %v79_v24 = vld [vmem:[#allocation6] sm:$0x1]  ;;  %vm110_vm0 = vcmask 261120   ;;  %vm140_vm1 = vcmask 1041408  }
  0x1c   :  { %v300_v23 = vor.u32 %v316_v20, %v297_v22  ;;  %v164_v25 = vld [vmem:[#allocation6 + $0x1] sm:$0x1]  ;;  %v84_v26 = vld [vmem:[#allocation9] sm:$0x3]  ;;  %v171_v32 = vld [vmem:[#allocation9 + $0x2] sm:$0x3] }
  0x1d   :  { %121 = vmatpush.bf16.msra.mxu0 %v278_v16  ;;  %v86_v27 = vperm.slane %v84_v26, 0  ;;  %v87_v28 = vperm.slane %v84_v26, 1  ;;  %v173_v35 = vperm.slane %v171_v32, 0  ;;  %v174_v37 = vperm.slane %v171_v32, 1  ;;  %s157_s1 = sld [smem:[#allocation2]]  ;;  %s469_s12 = smov [#allocation10]  }
  0x1e   :  { %134 = vmatpush.bf16.msra.mxu1 %v282_v17  ;;  %207 = vmatpush.bf16.msra.mxu2 %v296_v21  ;;  %s311_s3 = sld [smem:[#allocation2 + $0x1]]  ;;  %s261_s13 = sshll.u32 %s469_s12, 4  ;;  %s262_s13 = int_to_ptr.vmem [resolvable:$true] %s261_s13 }
  0x1f   :  { %220 = vmatpush.bf16.msra.mxu3 %v300_v23  ;;  %s263_s16 = sshll.u32 %s523_s4, 4  ;;  %s264_s16 = int_to_ptr.hbm [resolvable:$true] %s263_s16 }
  0x20   :  { %291 = vmatmul.msk.bf16.vlgmr.msra.gmra.mxu0 %vm110_vm0, %v79_v24 }
  0x21   :  { %292 = vmatmul.msk.bf16.vlgmr.msra.gmra.mxu1 %vm110_vm0, %v79_v24  ;;  %309 = vmatmul.msk.bf16.vlgmr.msra.gmra.mxu2 %vm110_vm0, %v164_v25 }
  0x22   :  { %310 = vmatmul.msk.bf16.vlgmr.msra.gmra.mxu3 %vm110_vm0, %v164_v25 }
  0x23   :  { %v159_v9 = vstv %s157_s1 }
  0x24   :  { %v244_v10 = vstv %s311_s3 }
  0x9d   :  { %v123_v29 = vpop.f32.mrf.mxu0 }
  0x9e   :  { %v124_v30 = vadd.f32 %v123_v29, %v86_v27  ;;  %v136_v31 = vpop.f32.mrf.mxu1 }
  0x9f   :  { %v137_v33 = vadd.f32 %v136_v31, %v87_v28 }
  0xa0   :  { %v141_v34 = vsel %vm140_vm1, %v124_v30, -inf }
  0xa1   :  { %v142_v36 = vsel %vm140_vm1, %v137_v33, -inf }
  0xa2   :  { %v143_v38 = vmax.f32 %v141_v34, %v142_v36 }
  0xa4   :  { %v209_v39 = vpop.f32.mrf.mxu2  ;;  %144 = vmax.xlane.f32.xlu0 %v143_v38 }
  0xa5   :  { %v210_v40 = vadd.f32 %v209_v39, %v173_v35  ;;  %v222_v41 = vpop.f32.mrf.mxu3  ;;  %v125_v42 = vpop.f32.mrf.mxu0 }
  0xa6   :  { %v223_v43 = vadd.f32 %v222_v41, %v174_v37  ;;  %v138_v44 = vpop.f32.mrf.mxu1 }
  0xa7   :  { %v226_v45 = vsel %vm140_vm1, %v210_v40, -inf }
  0xa8   :  { %v227_v46 = vsel %vm140_vm1, %v223_v43, -inf }
  0xa9   :  { %v228_v47 = vmax.f32 %v226_v45, %v227_v46 }
  0xac   :  { %v211_v48 = vpop.f32.mrf.mxu2  ;;  %229 = vmax.xlane.f32.xlu0 %v228_v47 }
  0xad   :  { %v224_v49 = vpop.f32.mrf.mxu3 }
 0x117   :  { %v145_v50 = vpop.xlane.xlu0 %144 }
 0x118   :  { %v146_v51 = vsub.f32 %v124_v30, %v145_v50  ;;  %v147_v52 = vsub.f32 %v137_v33, %v145_v50 }
 0x11a   :  { %v148_v53 = vmul.f32 1.442695, %v146_v51  ;;  %v150_v54 = vmul.f32 1.442695, %v147_v52 }
 0x11c   :  { %331 = vpow2.f32 %v148_v53 }
 0x11d   :  { %333 = vpow2.f32 %v150_v54 }
 0x11f   :  { %v230_v55 = vpop.xlane.xlu0 %229 }
 0x120   :  { %v231_v56 = vsub.f32 %v210_v40, %v230_v55  ;;  %v232_v57 = vsub.f32 %v223_v43, %v230_v55 }
 0x122   :  { %v332_v58 = vpop.eup %331  ;;  %v233_v59 = vmul.f32 1.442695, %v231_v56  ;;  %v235_v60 = vmul.f32 1.442695, %v232_v57 }
 0x123   :  { %v334_v61 = vpop.eup %333  ;;  %v152_v62 = vsel %vm140_vm1, %v332_v58, 0.0 }
 0x124   :  { %335 = vpow2.f32 %v233_v59  ;;  %v153_v63 = vsel %vm140_vm1, %v334_v61, 0.0 }
 0x125   :  { %337 = vpow2.f32 %v235_v60  ;;  %v154_v0 = vadd.f32 %v153_v63, %v152_v62 }
 0x127   :  { %155 = vadd.xlane.f32.xlu1 %v154_v0 }
 0x12a   :  { %v336_v1 = vpop.eup %335 }
 0x12b   :  { %v338_v2 = vpop.eup %337  ;;  %v237_v3 = vsel %vm140_vm1, %v336_v1, 0.0 }
 0x12c   :  { %v238_v4 = vsel %vm140_vm1, %v338_v2, 0.0 }
 0x12d   :  { %v239_v5 = vadd.f32 %v238_v4, %v237_v3 }
 0x12f   :  { %240 = vadd.xlane.f32.xlu1 %v239_v5 }
 0x19a   :  { %v156_v6 = vpop.xlane.xlu1 %155 }
 0x19b   :  { %339 = vrcp.f32 %v156_v6 }
 0x1a1   :  { %v340_v8 = vpop.eup %339 }
 0x1a2   :  { %v241_v7 = vpop.xlane.xlu1 %240  ;;  %v160_v11 = vmul.f32 %v340_v8, %v159_v9 }
 0x1a3   :  { %341 = vrcp.f32 %v241_v7 }
 0x1a4   :  { %v162_v15 = vmul.f32 %v334_v61, %v160_v11  ;;  %v161_v17 = vmul.f32 %v332_v58, %v160_v11 }
 0x1a9   :  { %v342_v12 = vpop.eup %341 }
 0x1aa   :  { %v245_v13 = vmul.f32 %v342_v12, %v244_v10 }
 0x1ac   :  { %v247_v14 = vmul.f32 %v338_v2, %v245_v13  ;;  %v246_v16 = vmul.f32 %v336_v1, %v245_v13 }
 0x1ae   :  { %v249_v18 = vadd.f32 %v247_v14, %v162_v15  ;;  %v248_v19 = vadd.f32 %v246_v16, %v161_v17 }
 0x1b0   :  { %v252_v20 = vrot.slane %v249_v18, 6 }
 0x1b2   :  { %v253_v21 = vsel %vm140_vm1, %v248_v19, %v252_v20 }
 0x1b3   :  { %255 = vst [vmem:[#allocation10] sm:$0xf] %v253_v21 }
 0x1b4   :  { %266 = dma.vmem_to_hbm [thread:$0]  %s262_s13, 64, %s264_s16, [#allocation4]  }
 0x1b5   :  { %457 = dma.done.wait [#allocation4], 64  }
 0x1b6   :  { %458 = vsyncadd [#allocation4], 4294967232 }
 0x1b7   :  { %271 = vsyncpa [#allocation3], 1 }
 0x1b8   :  { %272 = vsyncpa [#allocation8], 1 }
 0x1b9   :  { %273 = vsyncpa [#allocation4], 1 }
 0x1ba   :  { %274 = vsyncpa [#allocation5], 1 }

</bundles_post_ra>
